<compile_context>
chip_gen: v5e
topology: v5e:2x2
jax: 0.10.0
libtpu: 0.0.40
codegen_flags: <defaults>
</compile_context>

<pallas_src>
import jax
import jax.numpy as jnp
from jax.experimental import pallas as pl
from jax.experimental.pallas import tpu as pltpu


LEAKY_SLOPE = 0.01  # nn.LeakyReLU() default negative_slope


def _leaky_relu(x):
    return jnp.where(x > 0, x, LEAKY_SLOPE * x)


def bigan_disc_kernel(x_ref, z_ref,
                      w1x_ref, w1z_ref, b1_ref,
                      w2_ref, b2_ref,
                      w3_ref, b3_ref,
                      w4_ref, b4_ref,
                      out_ref):
    """Full 4-layer MLP on one batch tile, batch on the 128-lane axis.

    Activations are [features, batch_tile] throughout; weights are
    [out_features, in_features] (PyTorch-native) and used as the matmul LHS.
    """
    x = x_ref[...]          # [bt, latent]
    z = z_ref[...]          # [bt, latent]

    # Layer 1 fuses torch.cat: W1 @ cat(x,z)^T == W1x @ x^T + W1z @ z^T.
    # dot_general contracts the in_features axis of both operands ("NT"
    # matmul), so x / z never need an explicit transpose.
    def mm_nt(w, a):        # w: [out, in], a: [bt, in]  ->  [out, bt]
        return jax.lax.dot_general(
            w, a, (((1,), (1,)), ((), ())),
            preferred_element_type=jnp.float32)

    h = mm_nt(w1x_ref[...], x) + mm_nt(w1z_ref[...], z) + b1_ref[...]  # [dim, bt]
    h = _leaky_relu(h)

    h = jnp.dot(w2_ref[...], h, preferred_element_type=jnp.float32) + b2_ref[...]
    h = _leaky_relu(h)

    h = jnp.dot(w3_ref[...], h, preferred_element_type=jnp.float32) + b3_ref[...]
    h = _leaky_relu(h)

    logits = jnp.dot(w4_ref[...], h, preferred_element_type=jnp.float32) + b4_ref[...]  # [1, bt]

    # Sigmoid: exp on the EUP, reciprocal on the EUP (no VALU divide).
    out_ref[...] = pl.reciprocal(1.0 + jnp.exp(-logits)).astype(out_ref.dtype)


def bigan_discriminator_a(x, z, params, *, batch_tile=None):
    """x: [B, latent_dim], z: [B, latent_dim]  ->  [B, 1] float32."""
    w1x, w1z, b1, w2, b2, w3, b3, w4, b4 = params
    B, latent_dim = x.shape
    dim = w2.shape[0]

    # Large, lane-aligned batch tile: multiple of 128 (lane-dense output),
    # capped at 512 rows (tile is tiny either way: 512x32 f32 = 64 KiB).
    if batch_tile is None:
        batch_tile = min(512, ((B + 127) // 128) * 128)
    assert batch_tile % 128 == 0, "batch_tile must be a multiple of 128"

    # Pad the batch so every grid step sees a full tile; extra rows are sliced
    # off at the end.
    B_pad = pl.cdiv(B, batch_tile) * batch_tile
    if B_pad != B:
        pad = ((0, B_pad - B), (0, 0))
        x = jnp.pad(x, pad)
        z = jnp.pad(z, pad)

    grid = (B_pad // batch_tile,)

    batch_map = lambda i: (i, 0)
    full_map = lambda i: (0, 0)

    in_specs = [
        pl.BlockSpec((batch_tile, latent_dim), batch_map),   # x tile
        pl.BlockSpec((batch_tile, latent_dim), batch_map),   # z tile
        pl.BlockSpec((dim, latent_dim), full_map),           # w1x
        pl.BlockSpec((dim, latent_dim), full_map),           # w1z
        pl.BlockSpec((dim, 1), full_map),                    # b1
        pl.BlockSpec((dim, dim), full_map),                  # w2
        pl.BlockSpec((dim, 1), full_map),                    # b2
        pl.BlockSpec((dim, dim), full_map),                  # w3
        pl.BlockSpec((dim, 1), full_map),                    # b3
        pl.BlockSpec((1, dim), full_map),                    # w4
        pl.BlockSpec((1, 1), full_map),                      # b4
    ]
    # Lane-dense output slab: [1, B_pad] with batch on the lane axis.
    out_spec = pl.BlockSpec((1, batch_tile), lambda i: (0, i))

    out = pl.pallas_call(
        bigan_disc_kernel,
        out_shape=jax.ShapeDtypeStruct((1, B_pad), jnp.float32),
        grid_spec=pltpu.PrefetchScalarGridSpec(
            num_scalar_prefetch=0,
            grid=grid,
            in_specs=in_specs,
            out_specs=out_spec,
        ),
        compiler_params=pltpu.CompilerParams(
            dimension_semantics=("parallel",)),
    )(x, z, w1x, w1z, b1, w2, b2, w3, b3, w4, b4)

    # Cheap wrapper-side reshape back to the PyTorch output shape [B, 1].
    return out[0, :B].reshape(B, 1)


def init_params(key, latent_dim, dim):
    """nn.Linear-style init (uniform +/- 1/sqrt(fan_in)).

    Weights are kept in PyTorch-native [out_features, in_features] layout;
    biases are [out_features, 1]. W1 is pre-split along in_features into
    (W1x, W1z) so the kernel can fuse torch.cat((x, z))."""
    sizes = [(2 * latent_dim, dim), (dim, dim), (dim, dim), (dim, 1)]
    raw = []
    for fan_in, fan_out in sizes:
        key, kw, kb = jax.random.split(key, 3)
        bound = 1.0 / (fan_in ** 0.5)
        w = jax.random.uniform(kw, (fan_out, fan_in), jnp.float32, -bound, bound)
        b = jax.random.uniform(kb, (fan_out, 1), jnp.float32, -bound, bound)
        raw += [w, b]
    w1, b1, w2, b2, w3, b3, w4, b4 = raw
    w1x, w1z = w1[:, :latent_dim], w1[:, latent_dim:]
    return (w1x, w1z, b1, w2, b2, w3, b3, w4, b4)


def _reference_forward(x, z, params):
    """Pure-JAX reference matching the PyTorch module."""
    w1x, w1z, b1, w2, b2, w3, b3, w4, b4 = params
    w1 = jnp.concatenate([w1x, w1z], axis=1)
    h = jnp.concatenate([x, z], axis=1)
    for w, b in [(w1, b1), (w2, b2), (w3, b3)]:
        h = h @ w.T + b[:, 0]
        h = jnp.where(h > 0, h, LEAKY_SLOPE * h)
    logits = h @ w4.T + b4[:, 0]
    return 1.0 / (1.0 + jnp.exp(-logits))


if __name__ == "__main__":
    latent_dim = 16
    dim = 32
    B = 256  # batch maps to the lane axis; multiple of 128 keeps tiles exact

    key = jax.random.PRNGKey(0)
    kx, kz, kp = jax.random.split(key, 3)
    x = jax.random.normal(kx, (B, latent_dim), jnp.float32)
    z = jax.random.normal(kz, (B, latent_dim), jnp.float32)
    params = init_params(kp, latent_dim, dim)

    # batch_tile=128 -> grid=(2,) so the "parallel" axis can feed both v7x TCs.
    out = bigan_discriminator_a(x, z, params, batch_tile=128)
    out = jax.block_until_ready(out)

    ref = _reference_forward(x, z, params)
    assert out.shape == (B, 1)
    assert jnp.allclose(out, ref, atol=1e-5, rtol=1e-5), "mismatch vs reference"

    print("KERNEL_OK")
</pallas_src>

<mosaic_0001>
module attributes {stable_mosaic.version = 11 : i64} {
  func.func @bigan_disc_kernel(%arg0: i32, %arg1: memref<128x16xf32, #tpu.memory_space<vmem>>, %arg2: memref<128x16xf32, #tpu.memory_space<vmem>>, %arg3: memref<32x16xf32, #tpu.memory_space<vmem>>, %arg4: memref<32x16xf32, #tpu.memory_space<vmem>>, %arg5: memref<32x1xf32, #tpu.memory_space<vmem>>, %arg6: memref<32x32xf32, #tpu.memory_space<vmem>>, %arg7: memref<32x1xf32, #tpu.memory_space<vmem>>, %arg8: memref<32x32xf32, #tpu.memory_space<vmem>>, %arg9: memref<32x1xf32, #tpu.memory_space<vmem>>, %arg10: memref<1x32xf32, #tpu.memory_space<vmem>>, %arg11: memref<1x1xf32, #tpu.memory_space<vmem>>, %arg12: memref<1x128xf32, #tpu.memory_space<vmem>>) attributes {dimension_semantics = [#tpu.dimension_semantics<parallel>], iteration_bounds = array<i64: 2>, scalar_prefetch = 0 : i64, scratch_operands = 0 : i64, tpu.core_type = #tpu.core_type<tc>, window_params = [{transform_indices = @transform_0, window_bounds = array<i64: 128, 16>}, {transform_indices = @transform_1, window_bounds = array<i64: 128, 16>}, {pipeline_mode = #tpu.pipeline_mode<synchronous>, transform_indices = @transform_2, window_bounds = array<i64: 32, 16>}, {pipeline_mode = #tpu.pipeline_mode<synchronous>, transform_indices = @transform_3, window_bounds = array<i64: 32, 16>}, {pipeline_mode = #tpu.pipeline_mode<synchronous>, transform_indices = @transform_4, window_bounds = array<i64: 32, 1>}, {pipeline_mode = #tpu.pipeline_mode<synchronous>, transform_indices = @transform_5, window_bounds = array<i64: 32, 32>}, {pipeline_mode = #tpu.pipeline_mode<synchronous>, transform_indices = @transform_6, window_bounds = array<i64: 32, 1>}, {pipeline_mode = #tpu.pipeline_mode<synchronous>, transform_indices = @transform_7, window_bounds = array<i64: 32, 32>}, {pipeline_mode = #tpu.pipeline_mode<synchronous>, transform_indices = @transform_8, window_bounds = array<i64: 32, 1>}, {pipeline_mode = #tpu.pipeline_mode<synchronous>, transform_indices = @transform_9, window_bounds = array<i64: 1, 32>}, {pipeline_mode = #tpu.pipeline_mode<synchronous>, transform_indices = @transform_10, window_bounds = array<i64: 1, 1>}, {transform_indices = @transform_11, window_bounds = array<i64: 1, 128>}]} {
    %c0 = arith.constant 0 : index
    %c0_0 = arith.constant 0 : index
    %0 = vector.load %arg1[%c0, %c0_0] : memref<128x16xf32, #tpu.memory_space<vmem>>, vector<128x16xf32>
    %c0_1 = arith.constant 0 : index
    %c0_2 = arith.constant 0 : index
    %1 = vector.load %arg2[%c0_1, %c0_2] : memref<128x16xf32, #tpu.memory_space<vmem>>, vector<128x16xf32>
    %c0_3 = arith.constant 0 : index
    %c0_4 = arith.constant 0 : index
    %2 = vector.load %arg3[%c0_3, %c0_4] : memref<32x16xf32, #tpu.memory_space<vmem>>, vector<32x16xf32>
    %cst = arith.constant dense<0.000000e+00> : vector<32x128xf32>
    %3 = tpu.matmul %2, %0, %cst {dimension_numbers = #tpu.dot_dimension_numbers<[1], [1], [0], [0], [0, 0, 1, 0], [], []>} : vector<32x16xf32>, vector<128x16xf32>, vector<32x128xf32> -> vector<32x128xf32>
    %c0_5 = arith.constant 0 : index
    %c0_6 = arith.constant 0 : index
    %4 = vector.load %arg4[%c0_5, %c0_6] : memref<32x16xf32, #tpu.memory_space<vmem>>, vector<32x16xf32>
    %cst_7 = arith.constant dense<0.000000e+00> : vector<32x128xf32>
    %5 = tpu.matmul %4, %1, %cst_7 {dimension_numbers = #tpu.dot_dimension_numbers<[1], [1], [0], [0], [0, 0, 1, 0], [], []>} : vector<32x16xf32>, vector<128x16xf32>, vector<32x128xf32> -> vector<32x128xf32>
    %6 = arith.addf %3, %5 : vector<32x128xf32>
    %c0_8 = arith.constant 0 : index
    %c0_9 = arith.constant 0 : index
    %7 = vector.load %arg5[%c0_8, %c0_9] : memref<32x1xf32, #tpu.memory_space<vmem>>, vector<32x1xf32>
    %8 = vector.broadcast %7 : vector<32x1xf32> to vector<32x128xf32>
    %9 = arith.addf %6, %8 : vector<32x128xf32>
    %cst_10 = arith.constant 0.000000e+00 : f32
    %10 = vector.broadcast %cst_10 : f32 to vector<32x128xf32>
    %11 = arith.cmpf ogt, %9, %10 : vector<32x128xf32>
    %cst_11 = arith.constant 0.00999999977 : f32
    %12 = vector.broadcast %cst_11 : f32 to vector<32x128xf32>
    %13 = arith.mulf %12, %9 : vector<32x128xf32>
    %14 = arith.select %11, %9, %13 : vector<32x128xi1>, vector<32x128xf32>
    %c0_12 = arith.constant 0 : index
    %c0_13 = arith.constant 0 : index
    %15 = vector.load %arg6[%c0_12, %c0_13] : memref<32x32xf32, #tpu.memory_space<vmem>>, vector<32x32xf32>
    %cst_14 = arith.constant dense<0.000000e+00> : vector<32x128xf32>
    %16 = tpu.matmul %15, %14, %cst_14 {dimension_numbers = #tpu.dot_dimension_numbers<[1], [0], [0], [1], [0, 0, 1, 1], [], []>} : vector<32x32xf32>, vector<32x128xf32>, vector<32x128xf32> -> vector<32x128xf32>
    %c0_15 = arith.constant 0 : index
    %c0_16 = arith.constant 0 : index
    %17 = vector.load %arg7[%c0_15, %c0_16] : memref<32x1xf32, #tpu.memory_space<vmem>>, vector<32x1xf32>
    %18 = vector.broadcast %17 : vector<32x1xf32> to vector<32x128xf32>
    %19 = arith.addf %16, %18 : vector<32x128xf32>
    %cst_17 = arith.constant 0.000000e+00 : f32
    %20 = vector.broadcast %cst_17 : f32 to vector<32x128xf32>
    %21 = arith.cmpf ogt, %19, %20 : vector<32x128xf32>
    %cst_18 = arith.constant 0.00999999977 : f32
    %22 = vector.broadcast %cst_18 : f32 to vector<32x128xf32>
    %23 = arith.mulf %22, %19 : vector<32x128xf32>
    %24 = arith.select %21, %19, %23 : vector<32x128xi1>, vector<32x128xf32>
    %c0_19 = arith.constant 0 : index
    %c0_20 = arith.constant 0 : index
    %25 = vector.load %arg8[%c0_19, %c0_20] : memref<32x32xf32, #tpu.memory_space<vmem>>, vector<32x32xf32>
    %cst_21 = arith.constant dense<0.000000e+00> : vector<32x128xf32>
    %26 = tpu.matmul %25, %24, %cst_21 {dimension_numbers = #tpu.dot_dimension_numbers<[1], [0], [0], [1], [0, 0, 1, 1], [], []>} : vector<32x32xf32>, vector<32x128xf32>, vector<32x128xf32> -> vector<32x128xf32>
    %c0_22 = arith.constant 0 : index
    %c0_23 = arith.constant 0 : index
    %27 = vector.load %arg9[%c0_22, %c0_23] : memref<32x1xf32, #tpu.memory_space<vmem>>, vector<32x1xf32>
    %28 = vector.broadcast %27 : vector<32x1xf32> to vector<32x128xf32>
    %29 = arith.addf %26, %28 : vector<32x128xf32>
    %cst_24 = arith.constant 0.000000e+00 : f32
    %30 = vector.broadcast %cst_24 : f32 to vector<32x128xf32>
    %31 = arith.cmpf ogt, %29, %30 : vector<32x128xf32>
    %cst_25 = arith.constant 0.00999999977 : f32
    %32 = vector.broadcast %cst_25 : f32 to vector<32x128xf32>
    %33 = arith.mulf %32, %29 : vector<32x128xf32>
    %34 = arith.select %31, %29, %33 : vector<32x128xi1>, vector<32x128xf32>
    %c0_26 = arith.constant 0 : index
    %c0_27 = arith.constant 0 : index
    %35 = vector.load %arg10[%c0_26, %c0_27] : memref<1x32xf32, #tpu.memory_space<vmem>>, vector<1x32xf32>
    %cst_28 = arith.constant dense<0.000000e+00> : vector<1x128xf32>
    %36 = tpu.matmul %35, %34, %cst_28 {dimension_numbers = #tpu.dot_dimension_numbers<[1], [0], [0], [1], [0, 0, 1, 1], [], []>} : vector<1x32xf32>, vector<32x128xf32>, vector<1x128xf32> -> vector<1x128xf32>
    %c0_29 = arith.constant 0 : index
    %c0_30 = arith.constant 0 : index
    %37 = vector.load %arg11[%c0_29, %c0_30] : memref<1x1xf32, #tpu.memory_space<vmem>>, vector<1x1xf32>
    %38 = vector.broadcast %37 : vector<1x1xf32> to vector<1x128xf32>
    %39 = arith.addf %36, %38 : vector<1x128xf32>
    %cst_31 = arith.constant 0.000000e+00 : f32
    %40 = vector.broadcast %cst_31 : f32 to vector<1x128xf32>
    %41 = arith.subf %40, %39 : vector<1x128xf32>
    %42 = math.exp %41 : vector<1x128xf32>
    %cst_32 = arith.constant 1.000000e+00 : f32
    %43 = vector.broadcast %cst_32 : f32 to vector<1x128xf32>
    %44 = arith.addf %43, %42 : vector<1x128xf32>
    %45 = tpu.reciprocal %44 : vector<1x128xf32> -> vector<1x128xf32>
    %c0_33 = arith.constant 0 : index
    %c0_34 = arith.constant 0 : index
    %46 = vector.load %arg12[%c0_33, %c0_34] : memref<1x128xf32, #tpu.memory_space<vmem>>, vector<1x128xf32>
    tpu.vector_store %arg12[%c0_33, %c0_34], %45 {strides = array<i32>} : memref<1x128xf32, #tpu.memory_space<vmem>>, vector<1x128xf32>,
    return
  }
  func.func @transform_0(%arg0: i32) -> (i32, i32) {
    %c0_i32 = arith.constant 0 : i32
    %c0_i32_0 = arith.constant 0 : i32
    return %arg0, %c0_i32 : i32, i32
  }
  func.func @transform_1(%arg0: i32) -> (i32, i32) {
    %c0_i32 = arith.constant 0 : i32
    %c0_i32_0 = arith.constant 0 : i32
    return %arg0, %c0_i32 : i32, i32
  }
  func.func @transform_2(%arg0: i32) -> (i32, i32) {
    %c0_i32 = arith.constant 0 : i32
    %c0_i32_0 = arith.constant 0 : i32
    %c0_i32_1 = arith.constant 0 : i32
    return %c0_i32, %c0_i32_0 : i32, i32
  }
  func.func @transform_3(%arg0: i32) -> (i32, i32) {
    %c0_i32 = arith.constant 0 : i32
    %c0_i32_0 = arith.constant 0 : i32
    %c0_i32_1 = arith.constant 0 : i32
    return %c0_i32, %c0_i32_0 : i32, i32
  }
  func.func @transform_4(%arg0: i32) -> (i32, i32) {
    %c0_i32 = arith.constant 0 : i32
    %c0_i32_0 = arith.constant 0 : i32
    %c0_i32_1 = arith.constant 0 : i32
    return %c0_i32, %c0_i32_0 : i32, i32
  }
  func.func @transform_5(%arg0: i32) -> (i32, i32) {
    %c0_i32 = arith.constant 0 : i32
    %c0_i32_0 = arith.constant 0 : i32
    %c0_i32_1 = arith.constant 0 : i32
    return %c0_i32, %c0_i32_0 : i32, i32
  }
  func.func @transform_6(%arg0: i32) -> (i32, i32) {
    %c0_i32 = arith.constant 0 : i32
    %c0_i32_0 = arith.constant 0 : i32
    %c0_i32_1 = arith.constant 0 : i32
    return %c0_i32, %c0_i32_0 : i32, i32
  }
  func.func @transform_7(%arg0: i32) -> (i32, i32) {
    %c0_i32 = arith.constant 0 : i32
    %c0_i32_0 = arith.constant 0 : i32
    %c0_i32_1 = arith.constant 0 : i32
    return %c0_i32, %c0_i32_0 : i32, i32
  }
  func.func @transform_8(%arg0: i32) -> (i32, i32) {
    %c0_i32 = arith.constant 0 : i32
    %c0_i32_0 = arith.constant 0 : i32
    %c0_i32_1 = arith.constant 0 : i32
    return %c0_i32, %c0_i32_0 : i32, i32
  }
  func.func @transform_9(%arg0: i32) -> (i32, i32) {
    %c0_i32 = arith.constant 0 : i32
    %c0_i32_0 = arith.constant 0 : i32
    %c0_i32_1 = arith.constant 0 : i32
    return %c0_i32, %c0_i32_0 : i32, i32
  }
  func.func @transform_10(%arg0: i32) -> (i32, i32) {
    %c0_i32 = arith.constant 0 : i32
    %c0_i32_0 = arith.constant 0 : i32
    %c0_i32_1 = arith.constant 0 : i32
    return %c0_i32, %c0_i32_0 : i32, i32
  }
  func.func @transform_11(%arg0: i32) -> (i32, i32) {
    %c0_i32 = arith.constant 0 : i32
    %c0_i32_0 = arith.constant 0 : i32
    return %c0_i32, %arg0 : i32, i32
  }
}

</mosaic_0001>

<bundles_post_ra>
// kernel: tpu_custom_call.1
= control target key start
LH: loop header
LB: loop body
LE: loop exit
PB: predicated region body
PF: predicated region fallthrough
CT: control target
= control target key end

     0   :  { %s1455_s0 = inlined_call_operand.vmem [shape: f32[256,16], index: 0, kind: input, shape index: {}]   ;;  %s1456_s1 = inlined_call_operand.vmem [shape: f32[256,16], index: 1, kind: input, shape index: {}]   ;;  %s1457_s2 = inlined_call_operand.vmem [shape: f32[32,16], index: 2, kind: input, shape index: {}]   ;;  %s1458_s3 = inlined_call_operand.vmem [shape: f32[32,16], index: 3, kind: input, shape index: {}]   ;;  %s1459_s4 = inlined_call_operand.vmem [shape: f32[32,1], index: 4, kind: input, shape index: {}]   ;;  %s1460_s5 = inlined_call_operand.vmem [shape: f32[32,32], index: 5, kind: input, shape index: {}]   ;;  %s1461_s6 = inlined_call_operand.vmem [shape: f32[32,1], index: 6, kind: input, shape index: {}]   ;;  %s1462_s7 = inlined_call_operand.vmem [shape: f32[32,32], index: 7, kind: input, shape index: {}]   ;;  %s1463_s8 = inlined_call_operand.vmem [shape: f32[32,1], index: 8, kind: input, shape index: {}]   ;;  %s1464_s9 = inlined_call_operand.vmem [shape: f32[1,32], index: 9, kind: input, shape index: {}]   ;;  %s1465_s10 = inlined_call_operand.<no memory space> [shape: f32[1,1], index: 10, kind: input, shape index: {}]   ;;  %s1466_s11 = inlined_call_operand.hbm [shape: f32[1,256], index: 11, kind: output, shape index: {}]  }
   0x1   :  { %v16_v0 = vstv %s1465_s10 }
   0x2   :  { %17 = vst [vmem:[#allocation2] sm:$0x1] %v16_v0 }
   0x3   :  { %18 = vsyncpa [#allocation4], 0 }
   0x4   :  { %20 = vsyncpa [#allocation4 + $0x1], 0  ;;  %s1196_s19 = smov 0   ;;  %s1198_s20 = smov 0  }
   0x5   :  { %s1200_s21 = smov 0   ;;  %s1202_s22 = smov 0  }
   0x6 LB: > { %s1217_s10 = sadd.s32 4294967295, %s1130_s22   ;;  %s962_s23 = sadd.s32 4294967294, %s1130_s22   ;;  %s1130_s22 = sphi %s1202_s22, %s1472_s22   ;;  %s1126_s21 = sphi %s1200_s21, %s1471_s21   ;;  %s1122_s20 = sphi %s1198_s20, %s1470_s20   ;;  %s1118_s19 = sphi %s1196_s19, %s1469_s19  }
   0x7   : > { %s1221_s24 = sadd.s32 1, %s1130_s22   ;;  %s274_s25 = sadd.s32 1, %s1126_s21 }
   0x8   : > { %s271_s26 = ssub.s32 %s1130_s22, %s1221_s24  ;;  %p284_p0 = scmp.ne.s32.totalorder %s1126_s21, %s1122_s20 }
   0x9   : > { %p272_p1 = scmp.eq.s32.totalorder %s271_s26, 0  ;;  %p285_p2 = scmp.eq.s32.totalorder %s1217_s10, 1 }
   0xa   : > { %p290_p3 = scmp.ne.s32.totalorder %s1122_s20, %s1118_s19  ;;  %p291_p4 = scmp.eq.s32.totalorder %s962_s23, 1 }
   0xb   : > { %s1232_s27 = scalar_select %p272_p1, %s1126_s21, %s274_s25  }
   0xc   : > { %p1234_p5 = por %p285_p2, %p284_p0  ;;  %p1238_p6 = por %p291_p4, %p290_p3 }
   0xd   : > { %p965_p7 = scmp.ge.s32.totalorder %s1130_s22, 1  ;;  %p354_p8 = scmp.lt.s32.totalorder %s1130_s22, 3 }
   0xf   : > { %p355_p9 = pnand %p965_p7, %p354_p8 }
  0x10   : > { %s966_s30 = sshll.u32 (!%p355_p9), %s1217_s10, 4  ;;  %s396_s13 = sand.u32 (!%p355_p9), 1, %s1122_s20  }
  0x11   : > { %358 = sbr.rel (%p355_p9) target bundleno = 757 (0x2f5), region = 64  ;;  %p399_p10 = scmp.lt.s32.totalorder (!%p355_p9), %s966_s30, 31 }
  0x12   : > { %s891_s17 = scalar_lea.hbm (!%p355_p9), %s1466_s11, %s1217_s10  ;;  %s397_s23 = scalar_lea.vmem (!%p355_p9), [#allocation3], %s396_s13 }
  0x13   : > { %s893_s25 = sshll.u32 (!%p355_p9), %s397_s23, 4  ;;  %s1088_s14 = scalar_lea.hbm (!%p355_p9), %s1466_s11, 2  ;;  %s894_s25 = int_to_ptr.vmem [resolvable:$true] %s893_s25 }
  0x16   : > { %s1474_s30 = smov (!%p399_p10, %s966_s30), 31  ;;  %vm450_vm0 = vcmask 130048   ;;  %v632_v17 = vld [vmem:[%s1459_s4 + $0x18] sm:$0xff]  ;;  %v1132_v20 = vmov 0   ;;  %v630_v21 = vld [vmem:[%s1459_s4 + $0x8] sm:$0xff]  ;;  %v631_v24 = vld [vmem:[%s1459_s4 + $0x10] sm:$0xff] }
  0x17   : > { %s967_s12 = sshll.u32 %s1474_s30, 3  ;;  %1061 = vset.pattern.permute.xlu0 %v1132_v20  ;;  %1062 = vset.pattern.permute.xlu1 %v1132_v20  ;;  %v629_v27 = vld [vmem:[%s1459_s4] sm:$0xff]  ;;  %v674_v30 = vld [vmem:[%s1461_s6 + $0x8] sm:$0xff]  ;;  %v757_v35 = vld [vmem:[%s1463_s8 + $0x10] sm:$0xff]  ;;  %vm697_vm5 = vcmask 261120  }
  0x18   : > { %s1248_s15 = scalar_lea.vmem %s1456_s1, %s967_s12  ;;  %s1253_s18 = scalar_lea.vmem %s1455_s0, %s967_s12  ;;  %650 = vperm.xlu0 %1061, %v632_v17   ;;  %1063 = vset.pattern.permute.xlu2 %v1132_v20  ;;  %v673_v38 = vld [vmem:[%s1461_s6] sm:$0xff]  ;;  %v756_v44 = vld [vmem:[%s1463_s8 + $0x8] sm:$0xff]  ;;  %v448_v47 = vld [vmem:[%s1458_s3 + $0x10] sm:$0xff] }
  0x19   : > { %v441_v1 = vld [vmem:[%s1248_s15 + $0x78] sm:$0xff]  ;;  %v440_v3 = vld [vmem:[%s1248_s15 + $0x70] sm:$0xff]  ;;  %v439_v5 = vld [vmem:[%s1248_s15 + $0x68] sm:$0xff]  ;;  %640 = vperm.xlu1 %1062, %v630_v21  }
  0x1a   : > { %v425_v2 = vld [vmem:[%s1253_s18 + $0x78] sm:$0xff]  ;;  %970 = vmatpush.xpose.msk.msra.mxu0 %vm450_vm0, %v441_v1  ;;  %v424_v4 = vld [vmem:[%s1253_s18 + $0x70] sm:$0xff]  ;;  %v423_v6 = vld [vmem:[%s1253_s18 + $0x68] sm:$0xff] }
  0x1b   : > { %990 = vmatpush.xpose.msk.msra.mxu1 %vm450_vm0, %v425_v2  ;;  %v438_v7 = vld [vmem:[%s1248_s15 + $0x60] sm:$0xff]  ;;  %v437_v9 = vld [vmem:[%s1248_s15 + $0x58] sm:$0xff]  ;;  %v436_v11 = vld [vmem:[%s1248_s15 + $0x50] sm:$0xff] }
  0x1c   : > { %v422_v8 = vld [vmem:[%s1253_s18 + $0x60] sm:$0xff]  ;;  %v421_v10 = vld [vmem:[%s1253_s18 + $0x58] sm:$0xff]  ;;  %v420_v12 = vld [vmem:[%s1253_s18 + $0x50] sm:$0xff] }
  0x1d   : > { %v435_v13 = vld [vmem:[%s1248_s15 + $0x48] sm:$0xff]  ;;  %v434_v15 = vld [vmem:[%s1248_s15 + $0x40] sm:$0xff]  ;;  %v433_v18 = vld [vmem:[%s1248_s15 + $0x38] sm:$0xff] }
  0x1e   : > { %971 = vmatpush.xpose.msk.msra.mxu0 %vm450_vm0, %v440_v3  ;;  %v419_v14 = vld [vmem:[%s1253_s18 + $0x48] sm:$0xff]  ;;  %v418_v16 = vld [vmem:[%s1253_s18 + $0x40] sm:$0xff]  ;;  %v417_v19 = vld [vmem:[%s1253_s18 + $0x38] sm:$0xff] }
  0x1f   : > { %991 = vmatpush.xpose.msk.msra.mxu1 %vm450_vm0, %v424_v4  ;;  %v432_v22 = vld [vmem:[%s1248_s15 + $0x30] sm:$0xff]  ;;  %v431_v25 = vld [vmem:[%s1248_s15 + $0x28] sm:$0xff]  ;;  %v430_v28 = vld [vmem:[%s1248_s15 + $0x20] sm:$0xff] }
  0x20   : > { %v416_v23 = vld [vmem:[%s1253_s18 + $0x30] sm:$0xff]  ;;  %v415_v26 = vld [vmem:[%s1253_s18 + $0x28] sm:$0xff]  ;;  %645 = vperm.xlu0 %1061, %v631_v24   ;;  %v414_v29 = vld [vmem:[%s1253_s18 + $0x20] sm:$0xff] }
  0x21   : > { %635 = vperm.xlu1 %1062, %v629_v27   ;;  %v429_v31 = vld [vmem:[%s1248_s15 + $0x18] sm:$0xff]  ;;  %v428_v33 = vld [vmem:[%s1248_s15 + $0x10] sm:$0xff]  ;;  %v427_v36 = vld [vmem:[%s1248_s15 + $0x8] sm:$0xff] }
  0x22   : > { %972 = vmatpush.xpose.msk.msra.mxu0 %vm450_vm0, %v439_v5  ;;  %v413_v32 = vld [vmem:[%s1253_s18 + $0x18] sm:$0xff]  ;;  %v412_v34 = vld [vmem:[%s1253_s18 + $0x10] sm:$0xff]  ;;  %v411_v37 = vld [vmem:[%s1253_s18 + $0x8] sm:$0xff] }
  0x23   : > { %992 = vmatpush.xpose.msk.msra.mxu1 %vm450_vm0, %v423_v6  ;;  %v426_v39 = vld [vmem:[%s1248_s15] sm:$0xff]  ;;  %v447_v45 = vld [vmem:[%s1458_s3 + $0x8] sm:$0xff]  ;;  %v444_v48 = vld [vmem:[%s1457_s2 + $0x10] sm:$0xff]  ;;  %s895_s15 = sshll.u32 %s891_s17, 4  ;;  %s896_s15 = int_to_ptr.hbm [resolvable:$true] %s895_s15 }
  0x24   : > { %v410_v40 = vld [vmem:[%s1253_s18] sm:$0xff]  ;;  %v443_v46 = vld [vmem:[%s1457_s2 + $0x8] sm:$0xff]  ;;  %v449_v49 = vld [vmem:[%s1458_s3 + $0x18] sm:$0xff]  ;;  %s883_s18 = scalar_lea.sflag [#allocation4], %s396_s13  ;;  %s1082_s10 = sshra.s32 %s896_s15, 4  ;;  %s1083_s10 = int_to_ptr.hbm [resolvable:$true] %s1082_s10 }
  0x25   : > { %v833_v41 = vld [vmem:[#allocation2] sm:$0x1]  ;;  %v445_v50 = vld [vmem:[%s1457_s2 + $0x18] sm:$0xff]  ;;  %v675_v17 = vld [vmem:[%s1461_s6 + $0x10] sm:$0xff]  ;;  %s1084_s26 = scalar_lea.hbm %s1083_s10, 1  ;;  %p1089_p0 = scmp.lt.s32.totalorder %s1083_s10, %s1466_s11 }
  0x26   : > { %973 = vmatpush.xpose.msk.msra.mxu0 %vm450_vm0, %v438_v7  ;;  %v446_v42 = vld [vmem:[%s1458_s3] sm:$0xff]  ;;  %v671_v20 = vld [vmem:[%s1460_s5 + $0x10] sm:$0xff]  ;;  %p1085_p11 = scmp.ne.s32.totalorder %s1083_s10, %s1084_s26  ;;  %p1090_p1 = scmp.lt.s32.totalorder %s1088_s14, %s1084_s26 }
  0x27   : > { %993 = vmatpush.xpose.msk.msra.mxu1 %vm450_vm0, %v422_v8  ;;  %v442_v43 = vld [vmem:[%s1457_s2] sm:$0xff] }
  0x28   : > { %684 = vperm.xlu0 %1061, %v674_v30   ;;  %v755_v21 = vld [vmem:[%s1463_s8] sm:$0xff]  ;;  %p1086_p12 = pnand %p1085_p11, %p1234_p5  ;;  %p1091_p2 = por %p1090_p1, %p1089_p0 }
  0x29   : > { %679 = vperm.xlu1 %1062, %v673_v38  }
  0x2a   : > { %974 = vmatpush.xpose.msk.msra.mxu0 %vm450_vm0, %v437_v9  ;;  %p1087_p13 = pneg %p1086_p12 }
  0x2b   : > { %994 = vmatpush.xpose.msk.msra.mxu1 %vm450_vm0, %v421_v10 }
  0x2c   : > { %p1092_p3 = pnand %p1091_p2, %p1087_p13 }
  0x2e   : > { %975 = vmatpush.xpose.msk.msra.mxu0 %vm450_vm0, %v436_v11  ;;  %v676_v11 = vld [vmem:[%s1461_s6 + $0x18] sm:$0xff] }
  0x2f   : > { %995 = vmatpush.xpose.msk.msra.mxu1 %vm450_vm0, %v420_v12  ;;  %694 = vperm.xlu2 %1063, %v676_v11  }
  0x30   : > { %771 = vperm.xlu0 %1061, %v757_v35  }
  0x31   : > { %766 = vperm.xlu1 %1062, %v756_v44   ;;  %v752_v44 = vld [vmem:[%s1462_s7 + $0x8] sm:$0xff] }
  0x32   : > { %976 = vmatpush.xpose.msk.msra.mxu0 %vm450_vm0, %v435_v13 }
  0x33   : > { %996 = vmatpush.xpose.msk.msra.mxu1 %vm450_vm0, %v419_v14 }
  0x36   : > { %977 = vmatpush.xpose.msk.msra.mxu0 %vm450_vm0, %v434_v15  ;;  %v669_v15 = vld [vmem:[%s1460_s5] sm:$0xff] }
  0x37   : > { %997 = vmatpush.xpose.msk.msra.mxu1 %vm450_vm0, %v418_v16  ;;  %689 = vperm.xlu2 %1063, %v675_v17  }
  0x38   : > { %836 = vperm.xlu0 %1061, %v833_v41  }
  0x3a   : > { %978 = vmatpush.xpose.msk.msra.mxu0 %vm450_vm0, %v433_v18  ;;  %v670_v18 = vld [vmem:[%s1460_s5 + $0x8] sm:$0xff] }
  0x3b   : > { %998 = vmatpush.xpose.msk.msra.mxu1 %vm450_vm0, %v417_v19  ;;  %v758_v19 = vld [vmem:[%s1463_s8 + $0x18] sm:$0xff] }
  0x3e   : > { %979 = vmatpush.xpose.msk.msra.mxu0 %vm450_vm0, %v432_v22  ;;  %v672_v22 = vld [vmem:[%s1460_s5 + $0x18] sm:$0xff] }
  0x3f   : > { %999 = vmatpush.xpose.msk.msra.mxu1 %vm450_vm0, %v416_v23  ;;  %776 = vperm.xlu2 %1063, %v758_v19  }
  0x42   : > { %980 = vmatpush.xpose.msk.msra.mxu0 %vm450_vm0, %v431_v25 }
  0x43   : > { %1000 = vmatpush.xpose.msk.msra.mxu1 %vm450_vm0, %v415_v26 }
  0x46   : > { %981 = vmatpush.xpose.msk.msra.mxu0 %vm450_vm0, %v430_v28 }
  0x47   : > { %1001 = vmatpush.xpose.msk.msra.mxu1 %vm450_vm0, %v414_v29  ;;  %761 = vperm.xlu2 %1063, %v755_v21  }
  0x4a   : > { %982 = vmatpush.xpose.msk.msra.mxu0 %vm450_vm0, %v429_v31 }
  0x4b   : > { %1002 = vmatpush.xpose.msk.msra.mxu1 %vm450_vm0, %v413_v32 }
  0x4e   : > { %983 = vmatpush.xpose.msk.msra.mxu0 %vm450_vm0, %v428_v33 }
  0x4f   : > { %1003 = vmatpush.xpose.msk.msra.mxu1 %vm450_vm0, %v412_v34 }
  0x52   : > { %984 = vmatpush.xpose.msk.msra.mxu0 %vm450_vm0, %v427_v36 }
  0x53   : > { %1004 = vmatpush.xpose.msk.msra.mxu1 %vm450_vm0, %v411_v37 }
  0x56   : > { %985 = vmatpush.xpose.msk.msra.mxu0 %vm450_vm0, %v426_v39 }
  0x57   : > { %1005 = vmatpush.xpose.msk.msra.mxu1 %vm450_vm0, %v410_v40 }
  0x59   : > { %986 = vmatmul.msk.f32.vlgmr.msra.gmra.mxu0 %vm450_vm0, %v446_v42  ;;  %v751_v42 = vld [vmem:[%s1462_s7] sm:$0xff] }
  0x5a   : > { %1006 = vmatmul.msk.f32.vlgmr.msra.gmra.mxu1 %vm450_vm0, %v442_v43 }
  0x61   : > { %987 = vmatmul.msk.f32.gmra.mxu0 %vm450_vm0, %v447_v45  ;;  %v753_v45 = vld [vmem:[%s1462_s7 + $0x10] sm:$0xff] }
  0x62   : > { %1007 = vmatmul.msk.f32.gmra.mxu1 %vm450_vm0, %v443_v46  ;;  %v754_v46 = vld [vmem:[%s1462_s7 + $0x18] sm:$0xff] }
  0x69   : > { %988 = vmatmul.msk.f32.gmra.mxu0 %vm450_vm0, %v448_v47 }
  0x6a   : > { %1008 = vmatmul.msk.f32.gmra.mxu1 %vm450_vm0, %v444_v48 }
  0x71   : > { %989 = vmatmul.msk.f32.gmra.mxu0 %vm450_vm0, %v449_v49 }
  0x72   : > { %1009 = vmatmul.msk.f32.gmra.mxu1 %vm450_vm0, %v445_v50 }
  0x89   : > { %v695_v25 = vpop.permute.xlu2 %694 }
  0x8a   : > { %v651_v55 = vpop.permute.xlu0 %650 }
  0x8b   : > { %v641_v56 = vpop.permute.xlu1 %640 }
  0x91   : > { %v690_v27 = vpop.permute.xlu2 %689 }
  0x92   : > { %v646_v60 = vpop.permute.xlu0 %645 }
  0x93   : > { %v636_v3 = vpop.permute.xlu1 %635 }
  0x99   : > { %v777_v49 = vpop.permute.xlu2 %776 }
  0x9a   : > { %v685_v29 = vpop.permute.xlu0 %684 }
  0x9b   : > { %v680_v33 = vpop.permute.xlu1 %679 }
  0xd6   : > { %v528_v51 = vpop.f32.mrf.mxu0 }
  0xd7   : > { %v617_v52 = vpop.f32.mrf.mxu1 }
  0xd8   : > { %v618_v0 = vadd.f32 %v617_v52, %v528_v51  ;;  %v772_v51 = vpop.permute.xlu0 %771 }
  0xda   : > { %v653_v6 = vadd.f32 %v636_v3, %v618_v0 }
  0xdc   : > { %v661_v13 = vmul.f32 0.01, %v653_v6  ;;  %vm657_vm4 = vcmp.gt.f32.partialorder %v653_v6, 0.0 }
  0xde   : > { %v531_v53 = vpop.f32.mrf.mxu0  ;;  %v665_v16 = vsel %vm657_vm4, %v653_v6, %v661_v13 }
  0xdf   : > { %v620_v54 = vpop.f32.mrf.mxu1 }
  0xe0   : > { %v621_v61 = vadd.f32 %v620_v54, %v531_v53  ;;  %v767_v53 = vpop.permute.xlu1 %766 }
  0xe2   : > { %v654_v4 = vadd.f32 %v641_v56, %v621_v61 }
  0xe4   : > { %v662_v10 = vmul.f32 0.01, %v654_v4  ;;  %vm658_vm3 = vcmp.gt.f32.partialorder %v654_v4, 0.0 }
  0xe6   : > { %v534_v57 = vpop.f32.mrf.mxu0  ;;  %v666_v14 = vsel %vm658_vm3, %v654_v4, %v662_v10  ;;  %v837_v4 = vpop.permute.xlu0 %836 }
  0xe7   : > { %v623_v58 = vpop.f32.mrf.mxu1 }
  0xe8   : > { %v624_v59 = vadd.f32 %v623_v58, %v534_v57  ;;  %v762_v57 = vpop.permute.xlu2 %761 }
  0xea   : > { %v655_v1 = vadd.f32 %v646_v60, %v624_v59 }
  0xec   : > { %v663_v8 = vmul.f32 0.01, %v655_v1  ;;  %vm659_vm2 = vcmp.gt.f32.partialorder %v655_v1, 0.0 }
  0xee   : > { %v537_v62 = vpop.f32.mrf.mxu0  ;;  %v667_v12 = vsel %vm659_vm2, %v655_v1, %v663_v8 }
  0xef   : > { %v626_v63 = vpop.f32.mrf.mxu1 }
  0xf0   : > { %v627_v2 = vadd.f32 %v626_v63, %v537_v62 }
  0xf2   : > { %v656_v5 = vadd.f32 %v651_v55, %v627_v2  ;;  %v832_v2 = vld [vmem:[%s1464_s9] sm:$0x1] }
  0xf4   : > { %vm660_vm1 = vcmp.gt.f32.partialorder %v656_v5, 0.0  ;;  %v664_v7 = vmul.f32 0.01, %v656_v5 }
  0xf6   : > { %v668_v9 = vsel %vm660_vm1, %v656_v5, %v664_v7  ;;  %v839_v5 = vperm.slane %v837_v4, 0 }
  0xf7   : > { %722 = vmatpush.msra.mxu2 %v668_v9 }
  0xf9   : > { %723 = vmatpush.msra.mxu2 %v667_v12 }
  0xfb   : > { %724 = vmatpush.msra.mxu2 %v666_v14 }
  0xfd   : > { %725 = vmatpush.msra.mxu2 %v665_v16 }
  0xfe   : > { %1010 = vmatmul.msk.f32.vlgmr.msra.gmra.mxu2 %vm697_vm5, %v669_v15 }
 0x106   : > { %1011 = vmatmul.msk.f32.gmra.mxu2 %vm697_vm5, %v670_v18 }
 0x10e   : > { %1012 = vmatmul.msk.f32.gmra.mxu2 %vm697_vm5, %v671_v20 }
 0x116   : > { %1013 = vmatmul.msk.f32.gmra.mxu2 %vm697_vm5, %v672_v22 }
 0x181   : > { %v727_v23 = vpop.f32.mrf.mxu2 }
 0x182   : > { %v728_v34 = vadd.f32 %v727_v23, %v680_v33 }
 0x184   : > { %v743_v40 = vmul.f32 0.01, %v728_v34  ;;  %vm739_vm9 = vcmp.gt.f32.partialorder %v728_v34, 0.0 }
 0x186   : > { %v747_v43 = vsel %vm739_vm9, %v728_v34, %v743_v40 }
 0x189   : > { %v730_v24 = vpop.f32.mrf.mxu2 }
 0x18a   : > { %v731_v31 = vadd.f32 %v730_v24, %v685_v29 }
 0x18c   : > { %v744_v38 = vmul.f32 0.01, %v731_v31  ;;  %vm740_vm8 = vcmp.gt.f32.partialorder %v731_v31, 0.0 }
 0x18e   : > { %v748_v41 = vsel %vm740_vm8, %v731_v31, %v744_v38 }
 0x191   : > { %v733_v26 = vpop.f32.mrf.mxu2 }
 0x192   : > { %v734_v28 = vadd.f32 %v733_v26, %v690_v27 }
 0x194   : > { %v745_v36 = vmul.f32 0.01, %v734_v28  ;;  %vm741_vm7 = vcmp.gt.f32.partialorder %v734_v28, 0.0 }
 0x196   : > { %v749_v39 = vsel %vm741_vm7, %v734_v28, %v745_v36 }
 0x199   : > { %v736_v30 = vpop.f32.mrf.mxu2 }
 0x19a   : > { %v737_v32 = vadd.f32 %v736_v30, %v695_v25 }
 0x19c   : > { %vm742_vm6 = vcmp.gt.f32.partialorder %v737_v32, 0.0  ;;  %v746_v35 = vmul.f32 0.01, %v737_v32 }
 0x19e   : > { %v750_v37 = vsel %vm742_vm6, %v737_v32, %v746_v35 }
 0x19f   : > { %803 = vmatpush.msra.mxu3 %v750_v37 }
 0x1a1   : > { %804 = vmatpush.msra.mxu3 %v749_v39 }
 0x1a3   : > { %805 = vmatpush.msra.mxu3 %v748_v41 }
 0x1a5   : > { %806 = vmatpush.msra.mxu3 %v747_v43 }
 0x1a6   : > { %1014 = vmatmul.msk.f32.vlgmr.msra.gmra.mxu3 %vm697_vm5, %v751_v42 }
 0x1ae   : > { %1015 = vmatmul.msk.f32.gmra.mxu3 %vm697_vm5, %v752_v44 }
 0x1b6   : > { %1016 = vmatmul.msk.f32.gmra.mxu3 %vm697_vm5, %v753_v45 }
 0x1be   : > { %1017 = vmatmul.msk.f32.gmra.mxu3 %vm697_vm5, %v754_v46 }
 0x229   : > { %v808_v47 = vpop.f32.mrf.mxu3 }
 0x22a   : > { %v809_v58 = vadd.f32 %v808_v47, %v762_v57 }
 0x22c   : > { %v824_v0 = vmul.f32 0.01, %v809_v58  ;;  %vm820_vm13 = vcmp.gt.f32.partialorder %v809_v58, 0.0 }
 0x22e   : > { %v828_v3 = vsel %vm820_vm13, %v809_v58, %v824_v0 }
 0x231   : > { %v811_v48 = vpop.f32.mrf.mxu3 }
 0x232   : > { %v812_v55 = vadd.f32 %v811_v48, %v767_v53 }
 0x234   : > { %v825_v62 = vmul.f32 0.01, %v812_v55  ;;  %vm821_vm12 = vcmp.gt.f32.partialorder %v812_v55, 0.0 }
 0x236   : > { %v829_v1 = vsel %vm821_vm12, %v812_v55, %v825_v62 }
 0x239   : > { %v814_v50 = vpop.f32.mrf.mxu3 }
 0x23a   : > { %v815_v52 = vadd.f32 %v814_v50, %v772_v51 }
 0x23c   : > { %v826_v60 = vmul.f32 0.01, %v815_v52  ;;  %vm822_vm11 = vcmp.gt.f32.partialorder %v815_v52, 0.0 }
 0x23e   : > { %v830_v63 = vsel %vm822_vm11, %v815_v52, %v826_v60 }
 0x241   : > { %v817_v54 = vpop.f32.mrf.mxu3 }
 0x242   : > { %v818_v56 = vadd.f32 %v817_v54, %v777_v49 }
 0x244   : > { %vm823_vm10 = vcmp.gt.f32.partialorder %v818_v56, 0.0  ;;  %v827_v59 = vmul.f32 0.01, %v818_v56 }
 0x246   : > { %v831_v61 = vsel %vm823_vm10, %v818_v56, %v827_v59 }
 0x247   : > { %855 = vmatpush.msrb.mxu2 %v831_v61 }
 0x249   : > { %856 = vmatpush.msrb.mxu2 %v830_v63 }
 0x24b   : > { %857 = vmatpush.msrb.mxu2 %v829_v1 }
 0x24d   : > { %858 = vmatpush.msrb.mxu2 %v828_v3 }
 0x24e   : > { %1018 = vmatmul.msk.f32.vlgmr.msrb.gmra.mxu2 %vm697_vm5, %v832_v2 }
 0x2d1   : > { %v860_v6 = vpop.f32.mrf.mxu2 }
 0x2d2   : > { %v861_v7 = vadd.f32 %v860_v6, %v839_v5 }
 0x2d4   : > { %v863_v8 = vsub.f32 0.0, %v861_v7 }
 0x2d6   : > { %v864_v9 = vmul.f32 1.442695, %v863_v8 }
 0x2d8   : > { %1064 = vpow2.f32 %v864_v9 }
 0x2de   : > { %v1065_v10 = vpop.eup %1064 }
 0x2df   : > { %v866_v11 = vadd.f32 1.0, %v1065_v10 }
 0x2e1   : > { %1066 = vrcp.f32 %v866_v11  ;;  %v878_v15 = vand.u32 2147483648, %v866_v11  ;;  %v876_v17 = vand.u32 2147483647, %v866_v11  ;;  %vm872_vm15 = vweird.f32 %v866_v11 }
 0x2e3   : > { %v879_v19 = vor.u32 1.1754944e-38, %v878_v15  ;;  %vm877_vm1 = vcmp.eq.f32.partialorder %v876_v17, 8.507059e+37 }
 0x2e7   : > { %v1067_v12 = vpop.eup %1066 }
 0x2e8   : > { %v868_v13 = vmul.f32 %v1067_v12, %v866_v11  ;;  %vm873_vm14 = vweird.f32 %v1067_v12 }
 0x2e9   : > { %vm874_vm0 = vmor %vm872_vm15, %vm873_vm14 }
 0x2ea   : > { %v869_v14 = vsub.f32 1.0, %v868_v13 }
 0x2ec   : > { %v870_v16 = vmul.f32 %v1067_v12, %v869_v14 }
 0x2ee   : > { %v871_v18 = vadd.f32 %v1067_v12, %v870_v16 }
 0x2f0   : > { %v875_v20 = vsel %vm874_vm0, %v1067_v12, %v871_v18 }
 0x2f1   : > { %v880_v21 = vsel %vm877_vm1, %v879_v19, %v875_v20 }
 0x2f2   : > { %881 = vst [vmem:[%s397_s23] sm:$0x1] %v880_v21 }
 0x2f3   : > { %1095 = shalt.err (!%p1092_p3)
}
 0x2f4   : > { %1021 = dma.vmem_to_hbm [thread:$0]  (%p1234_p5), %s894_s25, 16, %s896_s15, %s883_s18  }
 0x2f5 PF: > { %p1027_p4 = scmp.ge.s32.totalorder %s1130_s22, 2  ;;  %s907_s13 = sand.u32 1, %s1118_s19  }
 0x2f6   : > { %s908_s23 = scalar_lea.sflag [#allocation4], %s907_s13 }
 0x2f7   : > { %p1024_p7 = pnand %p1027_p4, %p1238_p6 }
 0x2f9   : > { %p1025_p8 = pneg %p1024_p7 }
 0x2fb   : > { %1113 = dma.done.wait (%p1025_p8), %s908_s23, 16  }
 0x2fc   : > { %1115 = vsyncadd (%p1025_p8), %s908_s23, 4294967280  ;;  %p23_p9 = scmp.ge.s32.totalorder %s1221_s24, 4   ;;  %s1469_s19 = smov %s1122_s20 }
 0x2fd   : > { %s1470_s20 = smov %s1126_s21  ;;  %s1471_s21 = smov %s1232_s27 }
 0x2fe   : > { %s1472_s22 = smov %s1221_s24  ;;  %25 = sbr.rel (!%p23_p9) target bundleno = 6 (0x6), region = 102 }
 0x303   :  { %913 = vsyncpa [#allocation4], 1 }
 0x304   :  { %915 = vsyncpa [#allocation4 + $0x1], 1 }

</bundles_post_ra>
